<compile_context>
chip_gen: v5e
topology: v5e:2x2
jax: 0.10.0
libtpu: 0.0.40
codegen_flags: <defaults>
</compile_context>

<pallas_src>
import jax
import jax.numpy as jnp
from jax.experimental import pallas as pl
from jax.experimental.pallas import tpu as pltpu

_LANE = 128
# Budgets sized for v7x's 64 MiB physical VMEM (safe everywhere). On v5e/v6e
# (128 MiB physical) these can be raised to ~96 / ~112 MiB for even larger tiles.
_TILE_VMEM_BUDGET = 40 * 1024 * 1024   # what the auto-tiler spends on buffers
_VMEM_LIMIT_BYTES = 60 * 1024 * 1024   # scoped limit passed to Mosaic (> 16/32 MiB defaults)
_MAX_TM = 2048

_SINGLE_BUFFER_WEIGHTS = True  # flipped off at runtime if Buffered(1) is rejected


def _round_up(x: int, m: int) -> int:
    return ((x + m - 1) // m) * m


def gated_layer_kernel(x1_ref, x2_ref, wc_ref, b_ref, out_ref):
    x1 = x1_ref[...]
    x2 = x2_ref[...]
    # Fused contraction: s = [x1 | x2] @ [[W1^T],[W2^T]] + b2.
    # Native-dtype operands (bf16 fast path), f32 accumulation on the MXU.
    xc = jnp.concatenate([x1, x2], axis=-1)
    s = jnp.dot(xc, wc_ref[...], preferred_element_type=jnp.float32) + b_ref[...]
    scale = jax.nn.sigmoid(s)  # f32, runs on the EUP
    # out = x1*scale + x2*(1-scale) == x2 + scale*(x1 - x2): 3 VPU ops in f32.
    x1f = x1.astype(jnp.float32)
    x2f = x2.astype(jnp.float32)
    out_ref[...] = (x2f + scale * (x1f - x2f)).astype(out_ref.dtype)


def prepare_params(w1, w2, b2):
    """One-time parameter prep -- keep OUT of the per-step hot path.

    w1: first_linear.weight  [D, D]  (PyTorch (out, in) layout, no bias)
    w2: second_linear.weight [D, D]
    b2: second_linear.bias   [D]
    Returns (wc, b): wc = [[W1^T],[W2^T]] of shape (2*Dp, Dp), b of shape (1, Dp),
    where Dp = D rounded up to a lane-dense multiple of 128.
    (For full bf16 MXU speed, cast w1/w2/b2 to bf16 before calling this.)
    """
    d = w1.shape[0]
    dp = _round_up(d, _LANE)
    if dp != d:
        pad2 = ((0, dp - d), (0, dp - d))
        w1p, w2p = jnp.pad(w1, pad2), jnp.pad(w2, pad2)
        bp = jnp.pad(b2, (0, dp - d))
    else:
        w1p, w2p, bp = w1, w2, b2
    wc = jnp.concatenate([w1p.T, w2p.T], axis=0)  # (2*Dp, Dp): x @ W^T for both linears
    return wc, bp.reshape(1, dp)


def _choose_tm(n_rows, d_pad, in_dtype, w_dtype, vmem_budget_bytes):
    in_bytes = jnp.dtype(in_dtype).itemsize
    w_bytes = jnp.dtype(w_dtype).itemsize
    # Resident params, worst case double-buffered: fused weight + bias.
    param_bytes = 2 * (2 * d_pad * d_pad + d_pad) * w_bytes
    # Double-buffered row tiles for x1, x2 and the output.
    per_row = 2 * 3 * d_pad * in_bytes
    avail = max(vmem_budget_bytes - param_bytes, 16 * per_row)
    tm = min(int(avail // per_row), _MAX_TM)
    # Keep >= 2 grid steps when N allows it so v7x's two TensorCores share work.
    if n_rows > 16:
        tm = min(tm, _round_up(pl.cdiv(n_rows, 2), 16))
    return max(16, (tm // 16) * 16)  # sublane-friendly for both f32 and bf16


def _param_spec(shape, single_buffer):
    # Constant-index (resident) block: single-buffering halves its VMEM footprint
    # (matters most inside v7x's 64 MiB) and costs nothing -- it is DMA'd once.
    kwargs = {"pipeline_mode": pl.Buffered(buffer_count=1)} if single_buffer else {}
    return pl.BlockSpec(shape, lambda i: (0, 0), **kwargs)


def gated_layer(first_input, second_input, wc, b, *, tm=None,
                vmem_budget_bytes=_TILE_VMEM_BUDGET):
    """first_input, second_input: [N, D]; (wc, b) come from prepare_params()."""
    global _SINGLE_BUFFER_WEIGHTS
    n, d = first_input.shape
    assert second_input.shape == (n, d)
    dp = wc.shape[1]
    assert wc.shape == (2 * dp, dp) and b.shape == (1, dp) and d <= dp

    in_dtype = first_input.dtype
    if tm is None:
        tm = _choose_tm(n, dp, in_dtype, wc.dtype, vmem_budget_bytes)
    assert tm % 8 == 0, "row tile must be a multiple of 8 sublanes"
    n_pad = _round_up(max(n, tm), tm)

    if n_pad != n or dp != d:
        pad = ((0, n_pad - n), (0, dp - d))
        x1 = jnp.pad(first_input, pad)
        x2 = jnp.pad(second_input, pad)
    else:
        x1, x2 = first_input, second_input

    grid = (n_pad // tm,)

    def build(single_buffer):
        return pl.pallas_call(
            gated_layer_kernel,
            out_shape=jax.ShapeDtypeStruct((n_pad, dp), in_dtype),
            grid_spec=pltpu.PrefetchScalarGridSpec(
                num_scalar_prefetch=0,
                grid=grid,
                in_specs=[
                    pl.BlockSpec((tm, dp), lambda i: (i, 0)),   # x1 row tile
                    pl.BlockSpec((tm, dp), lambda i: (i, 0)),   # x2 row tile
                    _param_spec((2 * dp, dp), single_buffer),   # fused [[W1^T],[W2^T]]
                    _param_spec((1, dp), single_buffer),        # second_linear bias
                ],
                out_specs=pl.BlockSpec((tm, dp), lambda i: (i, 0)),
            ),
            compiler_params=pltpu.CompilerParams(
                dimension_semantics=("parallel",),
                vmem_limit_bytes=_VMEM_LIMIT_BYTES,
            ),
        )

    attempts = (True, False) if _SINGLE_BUFFER_WEIGHTS else (False,)
    out_pad = None
    for single_buffer in attempts:
        try:
            out_pad = build(single_buffer)(x1, x2, wc, b)
            break
        except Exception:
            if single_buffer:
                # This jax version rejects Buffered(1) on pallas_call specs; fall
                # back to default double buffering (perf-only, never correctness).
                _SINGLE_BUFFER_WEIGHTS = False
                continue
            raise
    return out_pad[:n, :d]


def gated_layer_ref(first_input, second_input, w1, w2, b2):
    """Pure-JAX reference matching the PyTorch forward."""
    s = first_input @ w1.T + (second_input @ w2.T + b2)
    scale = jax.nn.sigmoid(s)
    return first_input * scale + second_input * (1.0 - scale)


if __name__ == "__main__":
    # Small shapes consistent with the module: N nodes, in_feat_dim = D.
    N, D = 64, 32
    key = jax.random.PRNGKey(0)
    k1, k2, kw1, kw2, kb2 = jax.random.split(key, 5)

    first_input = jax.random.normal(k1, (N, D), dtype=jnp.float32)
    second_input = jax.random.normal(k2, (N, D), dtype=jnp.float32)

    # Deterministic "nn.Linear"-style parameter init (uniform in +-1/sqrt(D)).
    bound = 1.0 / (D ** 0.5)
    w1 = jax.random.uniform(kw1, (D, D), jnp.float32, -bound, bound)  # first_linear.weight
    w2 = jax.random.uniform(kw2, (D, D), jnp.float32, -bound, bound)  # second_linear.weight
    b2 = jax.random.uniform(kb2, (D,), jnp.float32, -bound, bound)    # second_linear.bias

    # One-time param prep (transpose + lane-pad + K-fuse) outside the hot path.
    wc, b = prepare_params(w1, w2, b2)

    out = gated_layer(first_input, second_input, wc, b)
    out = jax.block_until_ready(out)

    ref = gated_layer_ref(first_input, second_input, w1, w2, b2)
    assert out.shape == (N, D)
    assert jnp.allclose(out, ref, atol=1e-5, rtol=1e-5), "mismatch vs reference"

    print("KERNEL_OK")
</pallas_src>

<mosaic_0001>
module attributes {stable_mosaic.version = 11 : i64} {
  func.func @gated_layer_kernel(%arg0: i32, %arg1: memref<32x128xf32, #tpu.memory_space<vmem>>, %arg2: memref<32x128xf32, #tpu.memory_space<vmem>>, %arg3: memref<256x128xf32, #tpu.memory_space<vmem>>, %arg4: memref<1x128xf32, #tpu.memory_space<vmem>>, %arg5: memref<32x128xf32, #tpu.memory_space<vmem>>) attributes {dimension_semantics = [#tpu.dimension_semantics<parallel>], iteration_bounds = array<i64: 2>, scalar_prefetch = 0 : i64, scratch_operands = 0 : i64, tpu.core_type = #tpu.core_type<tc>, window_params = [{transform_indices = @transform_0, window_bounds = array<i64: 32, 128>}, {transform_indices = @transform_1, window_bounds = array<i64: 32, 128>}, {pipeline_mode = #tpu.pipeline_mode<synchronous>, transform_indices = @transform_2, window_bounds = array<i64: 256, 128>}, {pipeline_mode = #tpu.pipeline_mode<synchronous>, transform_indices = @transform_3, window_bounds = array<i64: 1, 128>}, {transform_indices = @transform_4, window_bounds = array<i64: 32, 128>}]} {
    %c0 = arith.constant 0 : index
    %c0_0 = arith.constant 0 : index
    %0 = vector.load %arg1[%c0, %c0_0] : memref<32x128xf32, #tpu.memory_space<vmem>>, vector<32x128xf32>
    %c0_1 = arith.constant 0 : index
    %c0_2 = arith.constant 0 : index
    %1 = vector.load %arg2[%c0_1, %c0_2] : memref<32x128xf32, #tpu.memory_space<vmem>>, vector<32x128xf32>
    %2 = tpu.concatenate %0, %1 in 1 : vector<32x128xf32>, vector<32x128xf32> -> vector<32x256xf32>
    %c0_3 = arith.constant 0 : index
    %c0_4 = arith.constant 0 : index
    %3 = vector.load %arg3[%c0_3, %c0_4] : memref<256x128xf32, #tpu.memory_space<vmem>>, vector<256x128xf32>
    %cst = arith.constant dense<0.000000e+00> : vector<32x128xf32>
    %4 = tpu.matmul %2, %3, %cst {dimension_numbers = #tpu.dot_dimension_numbers<[1], [0], [0], [1], [0, 0, 1, 1], [], []>} : vector<32x256xf32>, vector<256x128xf32>, vector<32x128xf32> -> vector<32x128xf32>
    %c0_5 = arith.constant 0 : index
    %c0_6 = arith.constant 0 : index
    %5 = vector.load %arg4[%c0_5, %c0_6] : memref<1x128xf32, #tpu.memory_space<vmem>>, vector<1x128xf32>
    %6 = vector.broadcast %5 : vector<1x128xf32> to vector<32x128xf32>
    %7 = arith.addf %4, %6 : vector<32x128xf32>
    %8 = arith.negf %7 : vector<32x128xf32>
    %9 = math.exp %8 : vector<32x128xf32>
    %cst_7 = arith.constant 1.000000e+00 : f32
    %10 = vector.broadcast %cst_7 : f32 to vector<32x128xf32>
    %11 = arith.addf %10, %9 : vector<32x128xf32>
    %12 = arith.divf %10, %11 : vector<32x128xf32>
    %13 = arith.subf %0, %1 : vector<32x128xf32>
    %14 = arith.mulf %12, %13 : vector<32x128xf32>
    %15 = arith.addf %1, %14 : vector<32x128xf32>
    %c0_8 = arith.constant 0 : index
    %c0_9 = arith.constant 0 : index
    %16 = vector.load %arg5[%c0_8, %c0_9] : memref<32x128xf32, #tpu.memory_space<vmem>>, vector<32x128xf32>
    tpu.vector_store %arg5[%c0_8, %c0_9], %15 {strides = array<i32>} : memref<32x128xf32, #tpu.memory_space<vmem>>, vector<32x128xf32>,
    return
  }
  func.func @transform_0(%arg0: i32) -> (i32, i32) {
    %c0_i32 = arith.constant 0 : i32
    %c0_i32_0 = arith.constant 0 : i32
    return %arg0, %c0_i32 : i32, i32
  }
  func.func @transform_1(%arg0: i32) -> (i32, i32) {
    %c0_i32 = arith.constant 0 : i32
    %c0_i32_0 = arith.constant 0 : i32
    return %arg0, %c0_i32 : i32, i32
  }
  func.func @transform_2(%arg0: i32) -> (i32, i32) {
    %c0_i32 = arith.constant 0 : i32
    %c0_i32_0 = arith.constant 0 : i32
    %c0_i32_1 = arith.constant 0 : i32
    return %c0_i32, %c0_i32_0 : i32, i32
  }
  func.func @transform_3(%arg0: i32) -> (i32, i32) {
    %c0_i32 = arith.constant 0 : i32
    %c0_i32_0 = arith.constant 0 : i32
    %c0_i32_1 = arith.constant 0 : i32
    return %c0_i32, %c0_i32_0 : i32, i32
  }
  func.func @transform_4(%arg0: i32) -> (i32, i32) {
    %c0_i32 = arith.constant 0 : i32
    %c0_i32_0 = arith.constant 0 : i32
    return %arg0, %c0_i32 : i32, i32
  }
}

module attributes {stable_mosaic.version = 11 : i64} {
  func.func @gated_layer_kernel(%arg0: i32, %arg1: memref<32x128xf32, #tpu.memory_space<vmem>>, %arg2: memref<32x128xf32, #tpu.memory_space<vmem>>, %arg3: memref<256x128xf32, #tpu.memory_space<vmem>>, %arg4: memref<1x128xf32, #tpu.memory_space<vmem>>, %arg5: memref<32x128xf32, #tpu.memory_space<vmem>>) attributes {dimension_semantics = [#tpu.dimension_semantics<parallel>], iteration_bounds = array<i64: 2>, scalar_prefetch = 0 : i64, scratch_operands = 0 : i64, tpu.core_type = #tpu.core_type<tc>, window_params = [{transform_indices = @transform_0, window_bounds = array<i64: 32, 128>}, {transform_indices = @transform_1, window_bounds = array<i64: 32, 128>}, {pipeline_mode = #tpu.pipeline_mode<synchronous>, transform_indices = @transform_2, window_bounds = array<i64: 256, 128>}, {pipeline_mode = #tpu.pipeline_mode<synchronous>, transform_indices = @transform_3, window_bounds = array<i64: 1, 128>}, {transform_indices = @transform_4, window_bounds = array<i64: 32, 128>}]} {
    %c0 = arith.constant 0 : index
    %c0_0 = arith.constant 0 : index
    %0 = vector.load %arg1[%c0, %c0_0] : memref<32x128xf32, #tpu.memory_space<vmem>>, vector<32x128xf32>
    %c0_1 = arith.constant 0 : index
    %c0_2 = arith.constant 0 : index
    %1 = vector.load %arg2[%c0_1, %c0_2] : memref<32x128xf32, #tpu.memory_space<vmem>>, vector<32x128xf32>
    %2 = tpu.concatenate %0, %1 in 1 : vector<32x128xf32>, vector<32x128xf32> -> vector<32x256xf32>
    %c0_3 = arith.constant 0 : index
    %c0_4 = arith.constant 0 : index
    %3 = vector.load %arg3[%c0_3, %c0_4] : memref<256x128xf32, #tpu.memory_space<vmem>>, vector<256x128xf32>
    %cst = arith.constant dense<0.000000e+00> : vector<32x128xf32>
    %4 = tpu.matmul %2, %3, %cst {dimension_numbers = #tpu.dot_dimension_numbers<[1], [0], [0], [1], [0, 0, 1, 1], [], []>} : vector<32x256xf32>, vector<256x128xf32>, vector<32x128xf32> -> vector<32x128xf32>
    %c0_5 = arith.constant 0 : index
    %c0_6 = arith.constant 0 : index
    %5 = vector.load %arg4[%c0_5, %c0_6] : memref<1x128xf32, #tpu.memory_space<vmem>>, vector<1x128xf32>
    %6 = vector.broadcast %5 : vector<1x128xf32> to vector<32x128xf32>
    %7 = arith.addf %4, %6 : vector<32x128xf32>
    %8 = arith.negf %7 : vector<32x128xf32>
    %9 = math.exp %8 : vector<32x128xf32>
    %cst_7 = arith.constant 1.000000e+00 : f32
    %10 = vector.broadcast %cst_7 : f32 to vector<32x128xf32>
    %11 = arith.addf %10, %9 : vector<32x128xf32>
    %12 = arith.divf %10, %11 : vector<32x128xf32>
    %13 = arith.subf %0, %1 : vector<32x128xf32>
    %14 = arith.mulf %12, %13 : vector<32x128xf32>
    %15 = arith.addf %1, %14 : vector<32x128xf32>
    %c0_8 = arith.constant 0 : index
    %c0_9 = arith.constant 0 : index
    %16 = vector.load %arg5[%c0_8, %c0_9] : memref<32x128xf32, #tpu.memory_space<vmem>>, vector<32x128xf32>
    tpu.vector_store %arg5[%c0_8, %c0_9], %15 {strides = array<i32>} : memref<32x128xf32, #tpu.memory_space<vmem>>, vector<32x128xf32>,
    return
  }
  func.func @transform_0(%arg0: i32) -> (i32, i32) {
    %c0_i32 = arith.constant 0 : i32
    %c0_i32_0 = arith.constant 0 : i32
    return %arg0, %c0_i32 : i32, i32
  }
  func.func @transform_1(%arg0: i32) -> (i32, i32) {
    %c0_i32 = arith.constant 0 : i32
    %c0_i32_0 = arith.constant 0 : i32
    return %arg0, %c0_i32 : i32, i32
  }
  func.func @transform_2(%arg0: i32) -> (i32, i32) {
    %c0_i32 = arith.constant 0 : i32
    %c0_i32_0 = arith.constant 0 : i32
    %c0_i32_1 = arith.constant 0 : i32
    return %c0_i32, %c0_i32_0 : i32, i32
  }
  func.func @transform_3(%arg0: i32) -> (i32, i32) {
    %c0_i32 = arith.constant 0 : i32
    %c0_i32_0 = arith.constant 0 : i32
    %c0_i32_1 = arith.constant 0 : i32
    return %c0_i32, %c0_i32_0 : i32, i32
  }
  func.func @transform_4(%arg0: i32) -> (i32, i32) {
    %c0_i32 = arith.constant 0 : i32
    %c0_i32_0 = arith.constant 0 : i32
    return %arg0, %c0_i32 : i32, i32
  }
}

</mosaic_0001>

<bundles_post_ra>
// kernel: tpu_custom_call.1
= control target key start
LH: loop header
LB: loop body
LE: loop exit
PB: predicated region body
PF: predicated region fallthrough
CT: control target
= control target key end

     0   :  { %s1177_s0 = inlined_call_operand.hbm [shape: f32[64,128], index: 0, kind: input, shape index: {}]   ;;  %s1178_s1 = inlined_call_operand.hbm [shape: f32[64,128], index: 1, kind: input, shape index: {}]   ;;  %s1179_s2 = inlined_call_operand.hbm [shape: f32[256,128], index: 2, kind: input, shape index: {}]   ;;  %s1180_s3 = inlined_call_operand.vmem [shape: f32[1,128], index: 3, kind: input, shape index: {}]   ;;  %s1181_s4 = inlined_call_operand.hbm [shape: f32[64,128], index: 4, kind: output, shape index: {}]  }
   0x1   :  { %1186 = sst [smem:[#allocation13_spill]] %s1177_s0 }
   0x2   :  { %1187 = sst [smem:[#allocation14_spill]] %s1179_s2 }
   0x3   :  { %9 = vsyncpa [#allocation3], 0 }
   0x4   :  { %11 = vsyncpa [#allocation3 + $0x1], 0 }
   0x5   :  { %12 = vsyncpa [#allocation6], 0 }
   0x6   :  { %14 = vsyncpa [#allocation6 + $0x1], 0 }
   0x7   :  { %15 = vsyncpa [#allocation4], 0 }
   0x8   :  { %17 = vsyncpa [#allocation4 + $0x1], 0  ;;  %s932_s15 = smov 0   ;;  %s934_s16 = smov 0  }
   0x9   :  { %s936_s17 = smov 0   ;;  %s938_s18 = smov 0  }
   0xa LB: > { %s953_s19 = sadd.s32 4294967295, %s900_s18   ;;  %s594_s20 = sadd.s32 4294967294, %s900_s18   ;;  %s900_s18 = sphi %s938_s18, %s1201_s18   ;;  %s896_s17 = sphi %s936_s17, %s1200_s17   ;;  %s892_s16 = sphi %s934_s16, %s1199_s16   ;;  %s888_s15 = sphi %s932_s15, %s1198_s15  }
   0xb   : > { %p43_p0 = scmp.ne.s32.totalorder %s892_s16, %s888_s15  ;;  %p44_p1 = scmp.eq.s32.totalorder %s953_s19, 0 }
   0xc   : > { %p135_p2 = scmp.eq.s32.totalorder %s953_s19, 1  ;;  %p141_p3 = scmp.eq.s32.totalorder %s594_s20, 1 }
   0xd   : > { %p962_p4 = por %p44_p1, %p43_p0  ;;  %p595_p5 = scmp.ge.s32.totalorder %s900_s18, 1 }
   0xe   : > { %p967_p6 = por %p141_p3, %p43_p0  ;;  %p148_p7 = scmp.lt.s32.totalorder %s900_s18, 3 }
   0xf   : > { %s1190_s2 = sld [smem:[#allocation14_spill]]  ;;  %s902_s27 = smov [#allocation7]  }
  0x10   : > { %p975_p8 = pnand %p595_p5, %p148_p7  ;;  %s161_s28 = sshll.u32 %s902_s27, 4  ;;  %s162_s28 = int_to_ptr.vmem [resolvable:$true] %s161_s28 }
  0x11   : > { %s985_s29 = sadd.s32 1, %s900_s18   ;;  %s1182_s30 = smov 128  }
  0x12   : > { %p663_p9 = pneg %p975_p8  ;;  %s1184_s5 = smov 8  }
  0x13   : > { %s27_s6 = ssub.s32 %s900_s18, %s985_s29  ;;  %s30_s7 = sadd.s32 1, %s896_s17 }
  0x14   : > { %p664_p10 = pnand %p663_p9, %p44_p1  ;;  %p28_p12 = scmp.eq.s32.totalorder %s27_s6, 0 }
  0x15   : > { %s159_s25 = sshll.u32 %s1190_s2, 4  ;;  %p37_p13 = scmp.ne.s32.totalorder %s896_s17, %s892_s16  ;;  %s160_s25 = int_to_ptr.hbm [resolvable:$true] %s159_s25 }
  0x16   : > { %666 = dma.hbm_to_vmem [thread:$0]  (!%p664_p10), %s160_s25, 4096, %s162_s28, [#allocation6], %s1182_s30, %s1182_s30, %s1184_s5  }
  0x17   : > { %p38_p0 = scmp.eq.s32.totalorder %s900_s18, 0  ;;  %p679_p3 = scmp.lt.s32.totalorder %s900_s18, 2 }
  0x18   : > { %s998_s8 = scalar_select %p28_p12, %s896_s17, %s30_s7  }
  0x19   : > { %p39_p5 = por %p38_p0, %p37_p13  ;;  %p1002_p7 = por %p135_p2, %p37_p13 }
  0x1a   : > { %s178_s10 = sand.u32 1, %s896_s17   ;;  %s618_s11 = sshll.u32 %s900_s18, 5 }
  0x1b   : > { %s598_s12 = sshll.u32 %s178_s10, 5  ;;  %s1193_s0 = sld [smem:[#allocation13_spill]] }
  0x1c   : > { %s182_s24 = scalar_lea.vmem [#allocation2], %s598_s12  ;;  %p1013_p9 = pnand %p679_p3, %p39_p5 }
  0x1d   : > { %s190_s25 = sshll.u32 %s182_s24, 4  ;;  %s209_s7 = scalar_lea.hbm %s1178_s1, %s618_s11  ;;  %s191_s25 = int_to_ptr.vmem [resolvable:$true] %s190_s25 }
  0x1e   : > { %s204_s30 = scalar_lea.vmem [#allocation5], %s598_s12  ;;  %s210_s13 = sshll.u32 %s209_s7, 4  ;;  %s211_s13 = int_to_ptr.hbm [resolvable:$true] %s210_s13 }
  0x1f   : > { %s1020_s5 = sshll.u32 %s204_s30, 4  ;;  %s179_s14 = scalar_lea.sflag [#allocation3], %s178_s10  ;;  %s213_s5 = int_to_ptr.vmem [resolvable:$true] %s1020_s5 }
  0x20   : > { %p770_p10 = pneg %p1013_p9 }
  0x21   : > { %s187_s20 = scalar_lea.hbm %s1193_s0, %s618_s11  ;;  %s773_s6 = scalar_lea.hbm %s1193_s0, 64 }
  0x22   : > { %s188_s23 = sshll.u32 %s187_s20, 4  ;;  %s189_s23 = int_to_ptr.hbm [resolvable:$true] %s188_s23 }
  0x23   : > { %s766_s20 = sshra.s32 %s189_s23, 4  ;;  %s767_s20 = int_to_ptr.hbm [resolvable:$true] %s766_s20 }
  0x24   : > { %s768_s24 = scalar_lea.hbm %s767_s20, 32  ;;  %p774_p0 = scmp.lt.s32.totalorder %s767_s20, %s1193_s0 }
  0x25   : > { %p769_p2 = scmp.ne.s32.totalorder %s767_s20, %s768_s24  ;;  %p775_p3 = scmp.lt.s32.totalorder %s773_s6, %s768_s24 }
  0x27   : > { %p771_p12 = pnand %p770_p10, %p769_p2  ;;  %p776_p5 = por %p775_p3, %p774_p0 }
  0x29   : > { %p772_p13 = pneg %p771_p12 }
  0x2b   : > { %p777_p11 = pnand %p776_p5, %p772_p13 }
  0x2d   : > { %780 = shalt.err (!%p777_p11)
}
  0x2e   : > { %s1195_s30 = smov 8   ;;  %s1196_s10 = smov 128  }
  0x2f   : > { %670 = dma.hbm_to_vmem [thread:$0]  (!%p1013_p9), %s189_s23, 512, %s191_s25, %s179_s14, %s1196_s10, %s1196_s10, %s1195_s30  }
  0x30   : > { %s200_s2 = sand.u32 1, %s900_s18   ;;  %s796_s28 = sshra.s32 %s211_s13, 4  ;;  %s797_s28 = int_to_ptr.hbm [resolvable:$true] %s796_s28 }
  0x31   : > { %s201_s7 = scalar_lea.sflag [#allocation6], %s200_s2  ;;  %s798_s20 = scalar_lea.hbm %s797_s28, 32 }
  0x32   : > { %p799_p2 = scmp.ne.s32.totalorder %s797_s28, %s798_s20  ;;  %s803_s11 = scalar_lea.hbm %s1178_s1, 64 }
  0x33   : > { %p804_p13 = scmp.lt.s32.totalorder %s797_s28, %s1178_s1  ;;  %p805_p0 = scmp.lt.s32.totalorder %s803_s11, %s798_s20 }
  0x34   : > { %p801_p11 = pnand %p799_p2, %p770_p10 }
  0x35   : > { %p806_p3 = por %p805_p0, %p804_p13 }
  0x36   : > { %p802_p12 = pneg %p801_p11 }
  0x38   : > { %p807_p5 = pnand %p806_p3, %p802_p12 }
  0x3a   : > { %810 = shalt.err (!%p807_p5)
}
  0x3b   : > { %673 = dma.hbm_to_vmem [thread:$0]  (!%p1013_p9), %s211_s13, 512, %s213_s5, %s201_s7, %s1196_s10, %s1196_s10, %s1195_s30  }
  0x3c   : > { %224 = sbr.rel (%p975_p8) target bundleno = 283 (0x11b), region = 36  ;;  %s1057_s23 = sand.u32 (!%p975_p8), 1, %s892_s16  }
  0x3d   : > { %s1060_s0 = sshll.u32 (!%p975_p8), %s1057_s23, 5  ;;  %s227_s25 = scalar_lea.sflag (!%p975_p8), [#allocation3], %s1057_s23 }
  0x3e   : > { %s1064_s14 = scalar_lea.vmem (!%p975_p8), [#allocation2], %s1060_s0 }
  0x41   : > { %871 = dma.done.wait (%p962_p4), %s227_s25, 512  }
  0x42   : > { %873 = vsyncadd (%p962_p4), %s227_s25, 4294966784  ;;  %s236_s26 = sand.u32 1, %s953_s19   ;;  %s1072_s27 = scalar_lea.vmem [#allocation5], %s1060_s0 }
  0x43   : > { %s237_s5 = scalar_lea.sflag [#allocation6], %s236_s26 }
  0x44   : > { %875 = dma.done.wait (%p962_p4), %s237_s5, 512  }
  0x45   : > { %877 = vsyncadd (%p962_p4), %s237_s5, 4294966784 }
  0x46   : > { %879 = dma.done.wait (%p44_p1), [#allocation6], 4096  }
  0x47   : > { %881 = vsyncadd (%p44_p1), [#allocation6], 4294963200  ;;  %v302_v0 = vld [vmem:[#allocation7 + $0x78] sm:$0xff]  ;;  %v301_v1 = vld [vmem:[#allocation7 + $0x70] sm:$0xff]  ;;  %s1127_s30 = scalar_lea.vmem [#allocation8], %s1060_s0  ;;  %s620_s10 = sshll.u32 %s953_s19, 5 }
  0x48   : > { %v318_v2 = vld [vmem:[#allocation7 + $0xf8] sm:$0xff]  ;;  %323 = vmatpush.msra.mxu0 %v302_v0  ;;  %621 = vmatpush.msra.mxu2 %v302_v0  ;;  %v317_v3 = vld [vmem:[#allocation7 + $0xf0] sm:$0xff]  ;;  %v300_v4 = vld [vmem:[#allocation7 + $0x68] sm:$0xff]  ;;  %s485_s28 = scalar_lea.hbm %s1181_s4, %s620_s10  ;;  %s486_s19 = sshll.u32 %s1127_s30, 4  ;;  %s487_s19 = int_to_ptr.vmem [resolvable:$true] %s486_s19 }
  0x49   : > { %352 = vmatpush.msra.mxu1 %v318_v2  ;;  %637 = vmatpush.msra.mxu3 %v318_v2  ;;  %v316_v5 = vld [vmem:[#allocation7 + $0xe8] sm:$0xff]  ;;  %v299_v6 = vld [vmem:[#allocation7 + $0x60] sm:$0xff]  ;;  %v298_v8 = vld [vmem:[#allocation7 + $0x58] sm:$0xff]  ;;  %s488_s20 = sshll.u32 %s485_s28, 4  ;;  %s474_s24 = scalar_lea.sflag [#allocation4], %s1057_s23  ;;  %s489_s20 = int_to_ptr.hbm [resolvable:$true] %s488_s20 }
  0x4a   : > { %324 = vmatpush.msra.mxu0 %v301_v1  ;;  %622 = vmatpush.msra.mxu2 %v301_v1  ;;  %v315_v7 = vld [vmem:[#allocation7 + $0xe0] sm:$0xff]  ;;  %v314_v9 = vld [vmem:[#allocation7 + $0xd8] sm:$0xff]  ;;  %v297_v10 = vld [vmem:[#allocation7 + $0x50] sm:$0xff]  ;;  %s840_s6 = sshra.s32 %s489_s20, 4  ;;  %s846_s25 = scalar_lea.hbm %s1181_s4, 64  ;;  %s841_s6 = int_to_ptr.hbm [resolvable:$true] %s840_s6 }
  0x4b   : > { %353 = vmatpush.msra.mxu1 %v317_v3  ;;  %638 = vmatpush.msra.mxu3 %v317_v3  ;;  %v313_v11 = vld [vmem:[#allocation7 + $0xd0] sm:$0xff]  ;;  %v296_v12 = vld [vmem:[#allocation7 + $0x48] sm:$0xff]  ;;  %v295_v14 = vld [vmem:[#allocation7 + $0x40] sm:$0xff]  ;;  %s842_s11 = scalar_lea.hbm %s841_s6, 32  ;;  %p847_p9 = scmp.lt.s32.totalorder %s841_s6, %s1181_s4 }
  0x4c   : > { %325 = vmatpush.msra.mxu0 %v300_v4  ;;  %623 = vmatpush.msra.mxu2 %v300_v4  ;;  %v312_v13 = vld [vmem:[#allocation7 + $0xc8] sm:$0xff]  ;;  %v311_v15 = vld [vmem:[#allocation7 + $0xc0] sm:$0xff]  ;;  %v294_v16 = vld [vmem:[#allocation7 + $0x38] sm:$0xff]  ;;  %p843_p1 = scmp.ne.s32.totalorder %s841_s6, %s842_s11  ;;  %p848_p10 = scmp.lt.s32.totalorder %s846_s25, %s842_s11 }
  0x4d   : > { %354 = vmatpush.msra.mxu1 %v316_v5  ;;  %639 = vmatpush.msra.mxu3 %v316_v5  ;;  %v310_v17 = vld [vmem:[#allocation7 + $0xb8] sm:$0xff]  ;;  %v293_v18 = vld [vmem:[#allocation7 + $0x30] sm:$0xff]  ;;  %v292_v20 = vld [vmem:[#allocation7 + $0x28] sm:$0xff] }
  0x4e   : > { %326 = vmatpush.msra.mxu0 %v299_v6  ;;  %624 = vmatpush.msra.mxu2 %v299_v6  ;;  %v309_v19 = vld [vmem:[#allocation7 + $0xb0] sm:$0xff]  ;;  %v308_v21 = vld [vmem:[#allocation7 + $0xa8] sm:$0xff]  ;;  %v291_v22 = vld [vmem:[#allocation7 + $0x20] sm:$0xff]  ;;  %p844_p4 = pnand %p843_p1, %p1002_p7  ;;  %p849_p2 = por %p848_p10, %p847_p9 }
  0x4f   : > { %355 = vmatpush.msra.mxu1 %v315_v7  ;;  %640 = vmatpush.msra.mxu3 %v315_v7  ;;  %v307_v23 = vld [vmem:[#allocation7 + $0xa0] sm:$0xff]  ;;  %v290_v24 = vld [vmem:[#allocation7 + $0x18] sm:$0xff]  ;;  %v289_v26 = vld [vmem:[#allocation7 + $0x10] sm:$0xff] }
  0x50   : > { %327 = vmatpush.msra.mxu0 %v298_v8  ;;  %625 = vmatpush.msra.mxu2 %v298_v8  ;;  %v306_v25 = vld [vmem:[#allocation7 + $0x98] sm:$0xff]  ;;  %v305_v27 = vld [vmem:[#allocation7 + $0x90] sm:$0xff]  ;;  %v288_v28 = vld [vmem:[#allocation7 + $0x8] sm:$0xff]  ;;  %p845_p8 = pneg %p844_p4 }
  0x51   : > { %356 = vmatpush.msra.mxu1 %v314_v9  ;;  %641 = vmatpush.msra.mxu3 %v314_v9  ;;  %v304_v29 = vld [vmem:[#allocation7 + $0x88] sm:$0xff]  ;;  %v287_v30 = vld [vmem:[#allocation7] sm:$0xff]  ;;  %v1086_v32 = vld [vmem:[%s1064_s14 + $0x10] sm:$0xff] }
  0x52   : > { %328 = vmatpush.msra.mxu0 %v297_v10  ;;  %626 = vmatpush.msra.mxu2 %v297_v10  ;;  %v1083_v31 = vld [vmem:[%s1064_s14] sm:$0xff]  ;;  %v1092_v35 = vld [vmem:[%s1072_s27 + $0x10] sm:$0xff]  ;;  %v1099_v36 = vld [vmem:[%s1064_s14 + $0x8] sm:$0xff]  ;;  %p850_p11 = pnand %p849_p2, %p845_p8 }
  0x53   : > { %357 = vmatpush.msra.mxu1 %v313_v11  ;;  %642 = vmatpush.msra.mxu3 %v313_v11  ;;  %v303_v33 = vld [vmem:[#allocation7 + $0x80] sm:$0xff]  ;;  %v1102_v37 = vld [vmem:[%s1064_s14 + $0x18] sm:$0xff]  ;;  %v1105_v38 = vld [vmem:[%s1072_s27 + $0x8] sm:$0xff] }
  0x54   : > { %329 = vmatpush.msra.mxu0 %v296_v12  ;;  %627 = vmatpush.msra.mxu2 %v296_v12  ;;  %v1089_v34 = vld [vmem:[%s1072_s27] sm:$0xff]  ;;  %v1108_v39 = vld [vmem:[%s1072_s27 + $0x18] sm:$0xff] }
  0x55   : > { %358 = vmatpush.msra.mxu1 %v312_v13  ;;  %643 = vmatpush.msra.mxu3 %v312_v13  ;;  %v719_v40 = vld [vmem:[%s1180_s3] ss:$0 sm:$0xff]  ;;  %v457_v12 = vsub.f32 %v1083_v31, %v1089_v34 }
  0x56   : > { %330 = vmatpush.msra.mxu0 %v295_v14  ;;  %628 = vmatpush.msra.mxu2 %v295_v14 }
  0x57   : > { %359 = vmatpush.msra.mxu1 %v311_v15  ;;  %644 = vmatpush.msra.mxu3 %v311_v15 }
  0x58   : > { %331 = vmatpush.msra.mxu0 %v294_v16  ;;  %629 = vmatpush.msra.mxu2 %v294_v16 }
  0x59   : > { %360 = vmatpush.msra.mxu1 %v310_v17  ;;  %645 = vmatpush.msra.mxu3 %v310_v17 }
  0x5a   : > { %332 = vmatpush.msra.mxu0 %v293_v18  ;;  %630 = vmatpush.msra.mxu2 %v293_v18 }
  0x5b   : > { %361 = vmatpush.msra.mxu1 %v309_v19  ;;  %646 = vmatpush.msra.mxu3 %v309_v19 }
  0x5c   : > { %333 = vmatpush.msra.mxu0 %v292_v20  ;;  %631 = vmatpush.msra.mxu2 %v292_v20 }
  0x5d   : > { %362 = vmatpush.msra.mxu1 %v308_v21  ;;  %647 = vmatpush.msra.mxu3 %v308_v21 }
  0x5e   : > { %334 = vmatpush.msra.mxu0 %v291_v22  ;;  %632 = vmatpush.msra.mxu2 %v291_v22 }
  0x5f   : > { %363 = vmatpush.msra.mxu1 %v307_v23  ;;  %648 = vmatpush.msra.mxu3 %v307_v23 }
  0x60   : > { %335 = vmatpush.msra.mxu0 %v290_v24  ;;  %633 = vmatpush.msra.mxu2 %v290_v24 }
  0x61   : > { %364 = vmatpush.msra.mxu1 %v306_v25  ;;  %649 = vmatpush.msra.mxu3 %v306_v25  ;;  %v459_v25 = vsub.f32 %v1086_v32, %v1092_v35 }
  0x62   : > { %336 = vmatpush.msra.mxu0 %v289_v26  ;;  %634 = vmatpush.msra.mxu2 %v289_v26 }
  0x63   : > { %365 = vmatpush.msra.mxu1 %v305_v27  ;;  %650 = vmatpush.msra.mxu3 %v305_v27 }
  0x64   : > { %337 = vmatpush.msra.mxu0 %v288_v28  ;;  %635 = vmatpush.msra.mxu2 %v288_v28 }
  0x65   : > { %366 = vmatpush.msra.mxu1 %v304_v29  ;;  %651 = vmatpush.msra.mxu3 %v304_v29 }
  0x66   : > { %338 = vmatpush.msra.mxu0 %v287_v30  ;;  %636 = vmatpush.msra.mxu2 %v287_v30 }
  0x67   : > { %339 = vmatmul.f32.vlgmr.msra.gmra.mxu0 %v1083_v31  ;;  %345 = vmatmul.f32.vlgmr.msra.gmra.mxu2 %v1086_v32  ;;  %v458_v32 = vsub.f32 %v1099_v36, %v1105_v38 }
  0x68   : > { %367 = vmatpush.msra.mxu1 %v303_v33  ;;  %652 = vmatpush.msra.mxu3 %v303_v33 }
  0x69   : > { %368 = vmatmul.f32.vlgmr.msra.gmra.mxu1 %v1089_v34  ;;  %374 = vmatmul.f32.vlgmr.msra.gmra.mxu3 %v1092_v35 }
  0x6f   : > { %342 = vmatmul.f32.gmra.mxu0 %v1099_v36  ;;  %348 = vmatmul.f32.gmra.mxu2 %v1102_v37 }
  0x71   : > { %371 = vmatmul.f32.gmra.mxu1 %v1105_v38  ;;  %377 = vmatmul.f32.gmra.mxu3 %v1108_v39 }
  0xe4   : > { %v340_v41 = vpop.f32.mrf.mxu0 }
  0xe5   : > { %v341_v42 = vadd.f32 %v719_v40, %v340_v41 }
  0xe6   : > { %v369_v43 = vpop.f32.mrf.mxu1 }
  0xe7   : > { %v370_v44 = vadd.f32 %v369_v43, %v341_v42 }
  0xe9   : > { %v609_v45 = vmul.f32 -1.442695, %v370_v44 }
  0xea   : > { %v346_v46 = vpop.f32.mrf.mxu2 }
  0xeb   : > { %720 = vpow2.f32 %v609_v45  ;;  %v347_v47 = vadd.f32 %v719_v40, %v346_v46 }
  0xec   : > { %v343_v48 = vpop.f32.mrf.mxu0  ;;  %v375_v49 = vpop.f32.mrf.mxu3 }
  0xed   : > { %v344_v50 = vadd.f32 %v719_v40, %v343_v48  ;;  %v376_v51 = vadd.f32 %v375_v49, %v347_v47 }
  0xee   : > { %v372_v52 = vpop.f32.mrf.mxu1 }
  0xef   : > { %v611_v53 = vmul.f32 -1.442695, %v376_v51  ;;  %v373_v54 = vadd.f32 %v372_v52, %v344_v50 }
  0xf1   : > { %v721_v55 = vpop.eup %720  ;;  %722 = vpow2.f32 %v611_v53  ;;  %v610_v56 = vmul.f32 -1.442695, %v373_v54  ;;  %v460_v53 = vsub.f32 %v1102_v37, %v1108_v39 }
  0xf2   : > { %v393_v57 = vadd.f32 1.0, %v721_v55  ;;  %v349_v58 = vpop.f32.mrf.mxu2 }
  0xf3   : > { %724 = vpow2.f32 %v610_v56  ;;  %v350_v59 = vadd.f32 %v719_v40, %v349_v58 }
  0xf4   : > { %726 = vrcp.f32 %v393_v57  ;;  %v378_v60 = vpop.f32.mrf.mxu3  ;;  %v408_v6 = vand.u32 2147483648, %v393_v57  ;;  %vm402_vm0 = vweird.f32 %v393_v57  ;;  %v406_v9 = vand.u32 2147483647, %v393_v57 }
  0xf5   : > { %v379_v61 = vadd.f32 %v378_v60, %v350_v59 }
  0xf6   : > { %v409_v15 = vor.u32 1.1754944e-38, %v408_v6  ;;  %vm407_vm3 = vcmp.eq.f32.partialorder %v406_v9, 8.507059e+37 }
  0xf7   : > { %v723_v62 = vpop.eup %722  ;;  %v612_v63 = vmul.f32 -1.442695, %v379_v61 }
  0xf8   : > { %v395_v0 = vadd.f32 1.0, %v723_v62 }
  0xf9   : > { %v725_v1 = vpop.eup %724  ;;  %728 = vpow2.f32 %v612_v63 }
  0xfa   : > { %v727_v2 = vpop.eup %726  ;;  %730 = vrcp.f32 %v395_v0  ;;  %v394_v4 = vadd.f32 1.0, %v725_v1  ;;  %v438_v19 = vand.u32 2147483648, %v395_v0  ;;  %v436_v24 = vand.u32 2147483647, %v395_v0 }
  0xfb   : > { %v398_v3 = vmul.f32 %v727_v2, %v393_v57  ;;  %vm403_vm1 = vweird.f32 %v727_v2  ;;  %vm432_vm5 = vweird.f32 %v395_v0 }
  0xfc   : > { %732 = vrcp.f32 %v394_v4  ;;  %vm404_vm2 = vmor %vm402_vm0, %vm403_vm1  ;;  %v439_v29 = vor.u32 1.1754944e-38, %v438_v19  ;;  %v423_v30 = vand.u32 2147483648, %v394_v4  ;;  %vm417_vm7 = vweird.f32 %v394_v4 }
  0xfd   : > { %v399_v5 = vsub.f32 1.0, %v398_v3  ;;  %v421_v40 = vand.u32 2147483647, %v394_v4  ;;  %vm437_vm9 = vcmp.eq.f32.partialorder %v436_v24, 8.507059e+37 }
  0xfe   : > { %v424_v45 = vor.u32 1.1754944e-38, %v423_v30 }
  0xff   : > { %v729_v7 = vpop.eup %728  ;;  %v400_v8 = vmul.f32 %v727_v2, %v399_v5  ;;  %vm422_vm11 = vcmp.eq.f32.partialorder %v421_v40, 8.507059e+37 }
 0x100   : > { %v731_v10 = vpop.eup %730  ;;  %v1117_v11 = vadd.f32 1.0, %v729_v7 }
 0x101   : > { %v401_v13 = vadd.f32 %v727_v2, %v400_v8  ;;  %v428_v14 = vmul.f32 %v731_v10, %v395_v0  ;;  %vm433_vm4 = vweird.f32 %v731_v10 }
 0x102   : > { %734 = vrcp.f32 %v1117_v11  ;;  %v733_v16 = vpop.eup %732  ;;  %vm434_vm6 = vmor %vm432_vm5, %vm433_vm4  ;;  %v451_v48 = vand.u32 2147483647, %v1117_v11  ;;  %v453_v49 = vand.u32 2147483648, %v1117_v11  ;;  %vm447_vm13 = vweird.f32 %v1117_v11 }
 0x103   : > { %v405_v17 = vsel %vm404_vm2, %v727_v2, %v401_v13  ;;  %v429_v18 = vsub.f32 1.0, %v428_v14  ;;  %v413_v21 = vmul.f32 %v733_v16, %v394_v4  ;;  %vm418_vm8 = vweird.f32 %v733_v16 }
 0x104   : > { %v410_v20 = vsel %vm407_vm3, %v409_v15, %v405_v17  ;;  %vm419_vm10 = vmor %vm417_vm7, %vm418_vm8  ;;  %v454_v55 = vor.u32 1.1754944e-38, %v453_v49  ;;  %vm452_vm15 = vcmp.eq.f32.partialorder %v451_v48, 8.507059e+37 }
 0x105   : > { %v461_v22 = vmul.f32 %v457_v12, %v410_v20  ;;  %v430_v23 = vmul.f32 %v731_v10, %v429_v18  ;;  %v414_v26 = vsub.f32 1.0, %v413_v21 }
 0x107   : > { %v465_v27 = vadd.f32 %v461_v22, %v1089_v34  ;;  %v431_v28 = vadd.f32 %v731_v10, %v430_v23  ;;  %v415_v33 = vmul.f32 %v733_v16, %v414_v26 }
 0x108   : > { %v735_v31 = vpop.eup %734 }
 0x109   : > { %v435_v41 = vsel %vm434_vm6, %v731_v10, %v431_v28  ;;  %v443_v42 = vmul.f32 %v735_v31, %v1117_v11  ;;  %469 = vst [vmem:[%s1127_s30] sm:$0xff] %v465_v27  ;;  %v416_v43 = vadd.f32 %v733_v16, %v415_v33  ;;  %vm448_vm12 = vweird.f32 %v735_v31 }
 0x10a   : > { %v440_v34 = vsel %vm437_vm9, %v439_v29, %v435_v41  ;;  %vm449_vm14 = vmor %vm447_vm13, %vm448_vm12 }
 0x10b   : > { %v463_v44 = vmul.f32 %v459_v25, %v440_v34  ;;  %v444_v46 = vsub.f32 1.0, %v443_v42  ;;  %v420_v47 = vsel %vm419_vm10, %v733_v16, %v416_v43 }
 0x10c   : > { %v425_v51 = vsel %vm422_vm11, %v424_v45, %v420_v47 }
 0x10d   : > { %v467_v50 = vadd.f32 %v463_v44, %v1092_v35  ;;  %v445_v52 = vmul.f32 %v735_v31, %v444_v46  ;;  %v462_v36 = vmul.f32 %v458_v32, %v425_v51 }
 0x10f   : > { %v446_v54 = vadd.f32 %v735_v31, %v445_v52  ;;  %471 = vst [vmem:[%s1127_s30 + $0x10] sm:$0xff] %v467_v50  ;;  %v466_v35 = vadd.f32 %v462_v36, %v1105_v38 }
 0x111   : > { %v450_v56 = vsel %vm449_vm14, %v735_v31, %v446_v54  ;;  %470 = vst [vmem:[%s1127_s30 + $0x8] sm:$0xff] %v466_v35 }
 0x112   : > { %v455_v57 = vsel %vm452_vm15, %v454_v55, %v450_v56 }
 0x113   : > { %v464_v58 = vmul.f32 %v460_v53, %v455_v57 }
 0x115   : > { %v468_v37 = vadd.f32 %v464_v58, %v1108_v39 }
 0x117   : > { %472 = vst [vmem:[%s1127_s30 + $0x18] sm:$0xff] %v468_v37 }
 0x118   : > { %853 = shalt.err (!%p850_p11)
}
 0x119   : > { %s905_s23 = smov 128   ;;  %s906_s5 = smov 8  }
 0x11a   : > { %661 = dma.vmem_to_hbm [thread:$0]  (%p1002_p7), %s487_s19, 512, %s489_s20, %s474_s24, %s905_s23, %s905_s23, %s906_s5  }
 0x11b PF: > { %s503_s27 = sand.u32 1, %s888_s15   ;;  %p1197_p12 = scmp.ge.s32.totalorder %s900_s18, 2 }
 0x11c   : > { %s504_s21 = scalar_lea.sflag [#allocation4], %s503_s27 }
 0x11d   : > { %p675_p13 = pnand %p1197_p12, %p967_p6 }
 0x11f   : > { %p676_p0 = pneg %p675_p13 }
 0x121   : > { %883 = dma.done.wait (%p676_p0), %s504_s21, 512  }
 0x122   : > { %885 = vsyncadd (%p676_p0), %s504_s21, 4294966784  ;;  %p20_p3 = scmp.ge.s32.totalorder %s985_s29, 4   ;;  %s1198_s15 = smov %s892_s16 }
 0x123   : > { %s1199_s16 = smov %s896_s17  ;;  %s1200_s17 = smov %s998_s8 }
 0x124   : > { %s1201_s18 = smov %s985_s29  ;;  %22 = sbr.rel (!%p20_p3) target bundleno = 10 (0xa), region = 98 }
 0x129   :  { %510 = vsyncpa [#allocation3], 1 }
 0x12a   :  { %512 = vsyncpa [#allocation3 + $0x1], 1 }
 0x12b   :  { %513 = vsyncpa [#allocation6], 1 }
 0x12c   :  { %515 = vsyncpa [#allocation6 + $0x1], 1 }
 0x12d   :  { %516 = vsyncpa [#allocation4], 1 }
 0x12e   :  { %518 = vsyncpa [#allocation4 + $0x1], 1 }

// kernel: tpu_custom_call.1
= control target key start
LH: loop header
LB: loop body
LE: loop exit
PB: predicated region body
PF: predicated region fallthrough
CT: control target
= control target key end

     0   :  { %s1177_s0 = inlined_call_operand.hbm [shape: f32[64,128], index: 0, kind: input, shape index: {}]   ;;  %s1178_s1 = inlined_call_operand.hbm [shape: f32[64,128], index: 1, kind: input, shape index: {}]   ;;  %s1179_s2 = inlined_call_operand.hbm [shape: f32[256,128], index: 2, kind: input, shape index: {}]   ;;  %s1180_s3 = inlined_call_operand.vmem [shape: f32[1,128], index: 3, kind: input, shape index: {}]   ;;  %s1181_s4 = inlined_call_operand.hbm [shape: f32[64,128], index: 4, kind: output, shape index: {}]  }
   0x1   :  { %1186 = sst [smem:[#allocation13_spill]] %s1177_s0 }
   0x2   :  { %1187 = sst [smem:[#allocation14_spill]] %s1179_s2 }
   0x3   :  { %9 = vsyncpa [#allocation3], 0 }
   0x4   :  { %11 = vsyncpa [#allocation3 + $0x1], 0 }
   0x5   :  { %12 = vsyncpa [#allocation6], 0 }
   0x6   :  { %14 = vsyncpa [#allocation6 + $0x1], 0 }
   0x7   :  { %15 = vsyncpa [#allocation4], 0 }
   0x8   :  { %17 = vsyncpa [#allocation4 + $0x1], 0  ;;  %s932_s15 = smov 0   ;;  %s934_s16 = smov 0  }
   0x9   :  { %s936_s17 = smov 0   ;;  %s938_s18 = smov 0  }
   0xa LB: > { %s953_s19 = sadd.s32 4294967295, %s900_s18   ;;  %s594_s20 = sadd.s32 4294967294, %s900_s18   ;;  %s900_s18 = sphi %s938_s18, %s1201_s18   ;;  %s896_s17 = sphi %s936_s17, %s1200_s17   ;;  %s892_s16 = sphi %s934_s16, %s1199_s16   ;;  %s888_s15 = sphi %s932_s15, %s1198_s15  }
   0xb   : > { %p43_p0 = scmp.ne.s32.totalorder %s892_s16, %s888_s15  ;;  %p44_p1 = scmp.eq.s32.totalorder %s953_s19, 0 }
   0xc   : > { %p135_p2 = scmp.eq.s32.totalorder %s953_s19, 1  ;;  %p141_p3 = scmp.eq.s32.totalorder %s594_s20, 1 }
   0xd   : > { %p962_p4 = por %p44_p1, %p43_p0  ;;  %p595_p5 = scmp.ge.s32.totalorder %s900_s18, 1 }
   0xe   : > { %p967_p6 = por %p141_p3, %p43_p0  ;;  %p148_p7 = scmp.lt.s32.totalorder %s900_s18, 3 }
   0xf   : > { %s1190_s2 = sld [smem:[#allocation14_spill]]  ;;  %s902_s27 = smov [#allocation7]  }
  0x10   : > { %p975_p8 = pnand %p595_p5, %p148_p7  ;;  %s161_s28 = sshll.u32 %s902_s27, 4  ;;  %s162_s28 = int_to_ptr.vmem [resolvable:$true] %s161_s28 }
  0x11   : > { %s985_s29 = sadd.s32 1, %s900_s18   ;;  %s1182_s30 = smov 128  }
  0x12   : > { %p663_p9 = pneg %p975_p8  ;;  %s1184_s5 = smov 8  }
  0x13   : > { %s27_s6 = ssub.s32 %s900_s18, %s985_s29  ;;  %s30_s7 = sadd.s32 1, %s896_s17 }
  0x14   : > { %p664_p10 = pnand %p663_p9, %p44_p1  ;;  %p28_p12 = scmp.eq.s32.totalorder %s27_s6, 0 }
  0x15   : > { %s159_s25 = sshll.u32 %s1190_s2, 4  ;;  %p37_p13 = scmp.ne.s32.totalorder %s896_s17, %s892_s16  ;;  %s160_s25 = int_to_ptr.hbm [resolvable:$true] %s159_s25 }
  0x16   : > { %666 = dma.hbm_to_vmem [thread:$0]  (!%p664_p10), %s160_s25, 4096, %s162_s28, [#allocation6], %s1182_s30, %s1182_s30, %s1184_s5  }
  0x17   : > { %p38_p0 = scmp.eq.s32.totalorder %s900_s18, 0  ;;  %p679_p3 = scmp.lt.s32.totalorder %s900_s18, 2 }
  0x18   : > { %s998_s8 = scalar_select %p28_p12, %s896_s17, %s30_s7  }
  0x19   : > { %p39_p5 = por %p38_p0, %p37_p13  ;;  %p1002_p7 = por %p135_p2, %p37_p13 }
  0x1a   : > { %s178_s10 = sand.u32 1, %s896_s17   ;;  %s618_s11 = sshll.u32 %s900_s18, 5 }
  0x1b   : > { %s598_s12 = sshll.u32 %s178_s10, 5  ;;  %s1193_s0 = sld [smem:[#allocation13_spill]] }
  0x1c   : > { %s182_s24 = scalar_lea.vmem [#allocation2], %s598_s12  ;;  %p1013_p9 = pnand %p679_p3, %p39_p5 }
  0x1d   : > { %s190_s25 = sshll.u32 %s182_s24, 4  ;;  %s209_s7 = scalar_lea.hbm %s1178_s1, %s618_s11  ;;  %s191_s25 = int_to_ptr.vmem [resolvable:$true] %s190_s25 }
  0x1e   : > { %s204_s30 = scalar_lea.vmem [#allocation5], %s598_s12  ;;  %s210_s13 = sshll.u32 %s209_s7, 4  ;;  %s211_s13 = int_to_ptr.hbm [resolvable:$true] %s210_s13 }
  0x1f   : > { %s1020_s5 = sshll.u32 %s204_s30, 4  ;;  %s179_s14 = scalar_lea.sflag [#allocation3], %s178_s10  ;;  %s213_s5 = int_to_ptr.vmem [resolvable:$true] %s1020_s5 }
  0x20   : > { %p770_p10 = pneg %p1013_p9 }
  0x21   : > { %s187_s20 = scalar_lea.hbm %s1193_s0, %s618_s11  ;;  %s773_s6 = scalar_lea.hbm %s1193_s0, 64 }
  0x22   : > { %s188_s23 = sshll.u32 %s187_s20, 4  ;;  %s189_s23 = int_to_ptr.hbm [resolvable:$true] %s188_s23 }
  0x23   : > { %s766_s20 = sshra.s32 %s189_s23, 4  ;;  %s767_s20 = int_to_ptr.hbm [resolvable:$true] %s766_s20 }
  0x24   : > { %s768_s24 = scalar_lea.hbm %s767_s20, 32  ;;  %p774_p0 = scmp.lt.s32.totalorder %s767_s20, %s1193_s0 }
  0x25   : > { %p769_p2 = scmp.ne.s32.totalorder %s767_s20, %s768_s24  ;;  %p775_p3 = scmp.lt.s32.totalorder %s773_s6, %s768_s24 }
  0x27   : > { %p771_p12 = pnand %p770_p10, %p769_p2  ;;  %p776_p5 = por %p775_p3, %p774_p0 }
  0x29   : > { %p772_p13 = pneg %p771_p12 }
  0x2b   : > { %p777_p11 = pnand %p776_p5, %p772_p13 }
  0x2d   : > { %780 = shalt.err (!%p777_p11)
}
  0x2e   : > { %s1195_s30 = smov 8   ;;  %s1196_s10 = smov 128  }
  0x2f   : > { %670 = dma.hbm_to_vmem [thread:$0]  (!%p1013_p9), %s189_s23, 512, %s191_s25, %s179_s14, %s1196_s10, %s1196_s10, %s1195_s30  }
  0x30   : > { %s200_s2 = sand.u32 1, %s900_s18   ;;  %s796_s28 = sshra.s32 %s211_s13, 4  ;;  %s797_s28 = int_to_ptr.hbm [resolvable:$true] %s796_s28 }
  0x31   : > { %s201_s7 = scalar_lea.sflag [#allocation6], %s200_s2  ;;  %s798_s20 = scalar_lea.hbm %s797_s28, 32 }
  0x32   : > { %p799_p2 = scmp.ne.s32.totalorder %s797_s28, %s798_s20  ;;  %s803_s11 = scalar_lea.hbm %s1178_s1, 64 }
  0x33   : > { %p804_p13 = scmp.lt.s32.totalorder %s797_s28, %s1178_s1  ;;  %p805_p0 = scmp.lt.s32.totalorder %s803_s11, %s798_s20 }
  0x34   : > { %p801_p11 = pnand %p799_p2, %p770_p10 }
  0x35   : > { %p806_p3 = por %p805_p0, %p804_p13 }
  0x36   : > { %p802_p12 = pneg %p801_p11 }
  0x38   : > { %p807_p5 = pnand %p806_p3, %p802_p12 }
  0x3a   : > { %810 = shalt.err (!%p807_p5)
}
  0x3b   : > { %673 = dma.hbm_to_vmem [thread:$0]  (!%p1013_p9), %s211_s13, 512, %s213_s5, %s201_s7, %s1196_s10, %s1196_s10, %s1195_s30  }
  0x3c   : > { %224 = sbr.rel (%p975_p8) target bundleno = 283 (0x11b), region = 36  ;;  %s1057_s23 = sand.u32 (!%p975_p8), 1, %s892_s16  }
  0x3d   : > { %s1060_s0 = sshll.u32 (!%p975_p8), %s1057_s23, 5  ;;  %s227_s25 = scalar_lea.sflag (!%p975_p8), [#allocation3], %s1057_s23 }
  0x3e   : > { %s1064_s14 = scalar_lea.vmem (!%p975_p8), [#allocation2], %s1060_s0 }
  0x41   : > { %871 = dma.done.wait (%p962_p4), %s227_s25, 512  }
  0x42   : > { %873 = vsyncadd (%p962_p4), %s227_s25, 4294966784  ;;  %s236_s26 = sand.u32 1, %s953_s19   ;;  %s1072_s27 = scalar_lea.vmem [#allocation5], %s1060_s0 }
  0x43   : > { %s237_s5 = scalar_lea.sflag [#allocation6], %s236_s26 }
  0x44   : > { %875 = dma.done.wait (%p962_p4), %s237_s5, 512  }
  0x45   : > { %877 = vsyncadd (%p962_p4), %s237_s5, 4294966784 }
  0x46   : > { %879 = dma.done.wait (%p44_p1), [#allocation6], 4096  }
  0x47   : > { %881 = vsyncadd (%p44_p1), [#allocation6], 4294963200  ;;  %v302_v0 = vld [vmem:[#allocation7 + $0x78] sm:$0xff]  ;;  %v301_v1 = vld [vmem:[#allocation7 + $0x70] sm:$0xff]  ;;  %s1127_s30 = scalar_lea.vmem [#allocation8], %s1060_s0  ;;  %s620_s10 = sshll.u32 %s953_s19, 5 }
  0x48   : > { %v318_v2 = vld [vmem:[#allocation7 + $0xf8] sm:$0xff]  ;;  %323 = vmatpush.msra.mxu0 %v302_v0  ;;  %621 = vmatpush.msra.mxu2 %v302_v0  ;;  %v317_v3 = vld [vmem:[#allocation7 + $0xf0] sm:$0xff]  ;;  %v300_v4 = vld [vmem:[#allocation7 + $0x68] sm:$0xff]  ;;  %s485_s28 = scalar_lea.hbm %s1181_s4, %s620_s10  ;;  %s486_s19 = sshll.u32 %s1127_s30, 4  ;;  %s487_s19 = int_to_ptr.vmem [resolvable:$true] %s486_s19 }
  0x49   : > { %352 = vmatpush.msra.mxu1 %v318_v2  ;;  %637 = vmatpush.msra.mxu3 %v318_v2  ;;  %v316_v5 = vld [vmem:[#allocation7 + $0xe8] sm:$0xff]  ;;  %v299_v6 = vld [vmem:[#allocation7 + $0x60] sm:$0xff]  ;;  %v298_v8 = vld [vmem:[#allocation7 + $0x58] sm:$0xff]  ;;  %s488_s20 = sshll.u32 %s485_s28, 4  ;;  %s474_s24 = scalar_lea.sflag [#allocation4], %s1057_s23  ;;  %s489_s20 = int_to_ptr.hbm [resolvable:$true] %s488_s20 }
  0x4a   : > { %324 = vmatpush.msra.mxu0 %v301_v1  ;;  %622 = vmatpush.msra.mxu2 %v301_v1  ;;  %v315_v7 = vld [vmem:[#allocation7 + $0xe0] sm:$0xff]  ;;  %v314_v9 = vld [vmem:[#allocation7 + $0xd8] sm:$0xff]  ;;  %v297_v10 = vld [vmem:[#allocation7 + $0x50] sm:$0xff]  ;;  %s840_s6 = sshra.s32 %s489_s20, 4  ;;  %s846_s25 = scalar_lea.hbm %s1181_s4, 64  ;;  %s841_s6 = int_to_ptr.hbm [resolvable:$true] %s840_s6 }
  0x4b   : > { %353 = vmatpush.msra.mxu1 %v317_v3  ;;  %638 = vmatpush.msra.mxu3 %v317_v3  ;;  %v313_v11 = vld [vmem:[#allocation7 + $0xd0] sm:$0xff]  ;;  %v296_v12 = vld [vmem:[#allocation7 + $0x48] sm:$0xff]  ;;  %v295_v14 = vld [vmem:[#allocation7 + $0x40] sm:$0xff]  ;;  %s842_s11 = scalar_lea.hbm %s841_s6, 32  ;;  %p847_p9 = scmp.lt.s32.totalorder %s841_s6, %s1181_s4 }
  0x4c   : > { %325 = vmatpush.msra.mxu0 %v300_v4  ;;  %623 = vmatpush.msra.mxu2 %v300_v4  ;;  %v312_v13 = vld [vmem:[#allocation7 + $0xc8] sm:$0xff]  ;;  %v311_v15 = vld [vmem:[#allocation7 + $0xc0] sm:$0xff]  ;;  %v294_v16 = vld [vmem:[#allocation7 + $0x38] sm:$0xff]  ;;  %p843_p1 = scmp.ne.s32.totalorder %s841_s6, %s842_s11  ;;  %p848_p10 = scmp.lt.s32.totalorder %s846_s25, %s842_s11 }
  0x4d   : > { %354 = vmatpush.msra.mxu1 %v316_v5  ;;  %639 = vmatpush.msra.mxu3 %v316_v5  ;;  %v310_v17 = vld [vmem:[#allocation7 + $0xb8] sm:$0xff]  ;;  %v293_v18 = vld [vmem:[#allocation7 + $0x30] sm:$0xff]  ;;  %v292_v20 = vld [vmem:[#allocation7 + $0x28] sm:$0xff] }
  0x4e   : > { %326 = vmatpush.msra.mxu0 %v299_v6  ;;  %624 = vmatpush.msra.mxu2 %v299_v6  ;;  %v309_v19 = vld [vmem:[#allocation7 + $0xb0] sm:$0xff]  ;;  %v308_v21 = vld [vmem:[#allocation7 + $0xa8] sm:$0xff]  ;;  %v291_v22 = vld [vmem:[#allocation7 + $0x20] sm:$0xff]  ;;  %p844_p4 = pnand %p843_p1, %p1002_p7  ;;  %p849_p2 = por %p848_p10, %p847_p9 }
  0x4f   : > { %355 = vmatpush.msra.mxu1 %v315_v7  ;;  %640 = vmatpush.msra.mxu3 %v315_v7  ;;  %v307_v23 = vld [vmem:[#allocation7 + $0xa0] sm:$0xff]  ;;  %v290_v24 = vld [vmem:[#allocation7 + $0x18] sm:$0xff]  ;;  %v289_v26 = vld [vmem:[#allocation7 + $0x10] sm:$0xff] }
  0x50   : > { %327 = vmatpush.msra.mxu0 %v298_v8  ;;  %625 = vmatpush.msra.mxu2 %v298_v8  ;;  %v306_v25 = vld [vmem:[#allocation7 + $0x98] sm:$0xff]  ;;  %v305_v27 = vld [vmem:[#allocation7 + $0x90] sm:$0xff]  ;;  %v288_v28 = vld [vmem:[#allocation7 + $0x8] sm:$0xff]  ;;  %p845_p8 = pneg %p844_p4 }
  0x51   : > { %356 = vmatpush.msra.mxu1 %v314_v9  ;;  %641 = vmatpush.msra.mxu3 %v314_v9  ;;  %v304_v29 = vld [vmem:[#allocation7 + $0x88] sm:$0xff]  ;;  %v287_v30 = vld [vmem:[#allocation7] sm:$0xff]  ;;  %v1086_v32 = vld [vmem:[%s1064_s14 + $0x10] sm:$0xff] }
  0x52   : > { %328 = vmatpush.msra.mxu0 %v297_v10  ;;  %626 = vmatpush.msra.mxu2 %v297_v10  ;;  %v1083_v31 = vld [vmem:[%s1064_s14] sm:$0xff]  ;;  %v1092_v35 = vld [vmem:[%s1072_s27 + $0x10] sm:$0xff]  ;;  %v1099_v36 = vld [vmem:[%s1064_s14 + $0x8] sm:$0xff]  ;;  %p850_p11 = pnand %p849_p2, %p845_p8 }
  0x53   : > { %357 = vmatpush.msra.mxu1 %v313_v11  ;;  %642 = vmatpush.msra.mxu3 %v313_v11  ;;  %v303_v33 = vld [vmem:[#allocation7 + $0x80] sm:$0xff]  ;;  %v1102_v37 = vld [vmem:[%s1064_s14 + $0x18] sm:$0xff]  ;;  %v1105_v38 = vld [vmem:[%s1072_s27 + $0x8] sm:$0xff] }
  0x54   : > { %329 = vmatpush.msra.mxu0 %v296_v12  ;;  %627 = vmatpush.msra.mxu2 %v296_v12  ;;  %v1089_v34 = vld [vmem:[%s1072_s27] sm:$0xff]  ;;  %v1108_v39 = vld [vmem:[%s1072_s27 + $0x18] sm:$0xff] }
  0x55   : > { %358 = vmatpush.msra.mxu1 %v312_v13  ;;  %643 = vmatpush.msra.mxu3 %v312_v13  ;;  %v719_v40 = vld [vmem:[%s1180_s3] ss:$0 sm:$0xff]  ;;  %v457_v12 = vsub.f32 %v1083_v31, %v1089_v34 }
  0x56   : > { %330 = vmatpush.msra.mxu0 %v295_v14  ;;  %628 = vmatpush.msra.mxu2 %v295_v14 }
  0x57   : > { %359 = vmatpush.msra.mxu1 %v311_v15  ;;  %644 = vmatpush.msra.mxu3 %v311_v15 }
  0x58   : > { %331 = vmatpush.msra.mxu0 %v294_v16  ;;  %629 = vmatpush.msra.mxu2 %v294_v16 }
  0x59   : > { %360 = vmatpush.msra.mxu1 %v310_v17  ;;  %645 = vmatpush.msra.mxu3 %v310_v17 }
  0x5a   : > { %332 = vmatpush.msra.mxu0 %v293_v18  ;;  %630 = vmatpush.msra.mxu2 %v293_v18 }
  0x5b   : > { %361 = vmatpush.msra.mxu1 %v309_v19  ;;  %646 = vmatpush.msra.mxu3 %v309_v19 }
  0x5c   : > { %333 = vmatpush.msra.mxu0 %v292_v20  ;;  %631 = vmatpush.msra.mxu2 %v292_v20 }
  0x5d   : > { %362 = vmatpush.msra.mxu1 %v308_v21  ;;  %647 = vmatpush.msra.mxu3 %v308_v21 }
  0x5e   : > { %334 = vmatpush.msra.mxu0 %v291_v22  ;;  %632 = vmatpush.msra.mxu2 %v291_v22 }
  0x5f   : > { %363 = vmatpush.msra.mxu1 %v307_v23  ;;  %648 = vmatpush.msra.mxu3 %v307_v23 }
  0x60   : > { %335 = vmatpush.msra.mxu0 %v290_v24  ;;  %633 = vmatpush.msra.mxu2 %v290_v24 }
  0x61   : > { %364 = vmatpush.msra.mxu1 %v306_v25  ;;  %649 = vmatpush.msra.mxu3 %v306_v25  ;;  %v459_v25 = vsub.f32 %v1086_v32, %v1092_v35 }
  0x62   : > { %336 = vmatpush.msra.mxu0 %v289_v26  ;;  %634 = vmatpush.msra.mxu2 %v289_v26 }
  0x63   : > { %365 = vmatpush.msra.mxu1 %v305_v27  ;;  %650 = vmatpush.msra.mxu3 %v305_v27 }
  0x64   : > { %337 = vmatpush.msra.mxu0 %v288_v28  ;;  %635 = vmatpush.msra.mxu2 %v288_v28 }
  0x65   : > { %366 = vmatpush.msra.mxu1 %v304_v29  ;;  %651 = vmatpush.msra.mxu3 %v304_v29 }
  0x66   : > { %338 = vmatpush.msra.mxu0 %v287_v30  ;;  %636 = vmatpush.msra.mxu2 %v287_v30 }
  0x67   : > { %339 = vmatmul.f32.vlgmr.msra.gmra.mxu0 %v1083_v31  ;;  %345 = vmatmul.f32.vlgmr.msra.gmra.mxu2 %v1086_v32  ;;  %v458_v32 = vsub.f32 %v1099_v36, %v1105_v38 }
  0x68   : > { %367 = vmatpush.msra.mxu1 %v303_v33  ;;  %652 = vmatpush.msra.mxu3 %v303_v33 }
  0x69   : > { %368 = vmatmul.f32.vlgmr.msra.gmra.mxu1 %v1089_v34  ;;  %374 = vmatmul.f32.vlgmr.msra.gmra.mxu3 %v1092_v35 }
  0x6f   : > { %342 = vmatmul.f32.gmra.mxu0 %v1099_v36  ;;  %348 = vmatmul.f32.gmra.mxu2 %v1102_v37 }
  0x71   : > { %371 = vmatmul.f32.gmra.mxu1 %v1105_v38  ;;  %377 = vmatmul.f32.gmra.mxu3 %v1108_v39 }
  0xe4   : > { %v340_v41 = vpop.f32.mrf.mxu0 }
  0xe5   : > { %v341_v42 = vadd.f32 %v719_v40, %v340_v41 }
  0xe6   : > { %v369_v43 = vpop.f32.mrf.mxu1 }
  0xe7   : > { %v370_v44 = vadd.f32 %v369_v43, %v341_v42 }
  0xe9   : > { %v609_v45 = vmul.f32 -1.442695, %v370_v44 }
  0xea   : > { %v346_v46 = vpop.f32.mrf.mxu2 }
  0xeb   : > { %720 = vpow2.f32 %v609_v45  ;;  %v347_v47 = vadd.f32 %v719_v40, %v346_v46 }
  0xec   : > { %v343_v48 = vpop.f32.mrf.mxu0  ;;  %v375_v49 = vpop.f32.mrf.mxu3 }
  0xed   : > { %v344_v50 = vadd.f32 %v719_v40, %v343_v48  ;;  %v376_v51 = vadd.f32 %v375_v49, %v347_v47 }
  0xee   : > { %v372_v52 = vpop.f32.mrf.mxu1 }
  0xef   : > { %v611_v53 = vmul.f32 -1.442695, %v376_v51  ;;  %v373_v54 = vadd.f32 %v372_v52, %v344_v50 }
  0xf1   : > { %v721_v55 = vpop.eup %720  ;;  %722 = vpow2.f32 %v611_v53  ;;  %v610_v56 = vmul.f32 -1.442695, %v373_v54  ;;  %v460_v53 = vsub.f32 %v1102_v37, %v1108_v39 }
  0xf2   : > { %v393_v57 = vadd.f32 1.0, %v721_v55  ;;  %v349_v58 = vpop.f32.mrf.mxu2 }
  0xf3   : > { %724 = vpow2.f32 %v610_v56  ;;  %v350_v59 = vadd.f32 %v719_v40, %v349_v58 }
  0xf4   : > { %726 = vrcp.f32 %v393_v57  ;;  %v378_v60 = vpop.f32.mrf.mxu3  ;;  %v408_v6 = vand.u32 2147483648, %v393_v57  ;;  %vm402_vm0 = vweird.f32 %v393_v57  ;;  %v406_v9 = vand.u32 2147483647, %v393_v57 }
  0xf5   : > { %v379_v61 = vadd.f32 %v378_v60, %v350_v59 }
  0xf6   : > { %v409_v15 = vor.u32 1.1754944e-38, %v408_v6  ;;  %vm407_vm3 = vcmp.eq.f32.partialorder %v406_v9, 8.507059e+37 }
  0xf7   : > { %v723_v62 = vpop.eup %722  ;;  %v612_v63 = vmul.f32 -1.442695, %v379_v61 }
  0xf8   : > { %v395_v0 = vadd.f32 1.0, %v723_v62 }
  0xf9   : > { %v725_v1 = vpop.eup %724  ;;  %728 = vpow2.f32 %v612_v63 }
  0xfa   : > { %v727_v2 = vpop.eup %726  ;;  %730 = vrcp.f32 %v395_v0  ;;  %v394_v4 = vadd.f32 1.0, %v725_v1  ;;  %v438_v19 = vand.u32 2147483648, %v395_v0  ;;  %v436_v24 = vand.u32 2147483647, %v395_v0 }
  0xfb   : > { %v398_v3 = vmul.f32 %v727_v2, %v393_v57  ;;  %vm403_vm1 = vweird.f32 %v727_v2  ;;  %vm432_vm5 = vweird.f32 %v395_v0 }
  0xfc   : > { %732 = vrcp.f32 %v394_v4  ;;  %vm404_vm2 = vmor %vm402_vm0, %vm403_vm1  ;;  %v439_v29 = vor.u32 1.1754944e-38, %v438_v19  ;;  %v423_v30 = vand.u32 2147483648, %v394_v4  ;;  %vm417_vm7 = vweird.f32 %v394_v4 }
  0xfd   : > { %v399_v5 = vsub.f32 1.0, %v398_v3  ;;  %v421_v40 = vand.u32 2147483647, %v394_v4  ;;  %vm437_vm9 = vcmp.eq.f32.partialorder %v436_v24, 8.507059e+37 }
  0xfe   : > { %v424_v45 = vor.u32 1.1754944e-38, %v423_v30 }
  0xff   : > { %v729_v7 = vpop.eup %728  ;;  %v400_v8 = vmul.f32 %v727_v2, %v399_v5  ;;  %vm422_vm11 = vcmp.eq.f32.partialorder %v421_v40, 8.507059e+37 }
 0x100   : > { %v731_v10 = vpop.eup %730  ;;  %v1117_v11 = vadd.f32 1.0, %v729_v7 }
 0x101   : > { %v401_v13 = vadd.f32 %v727_v2, %v400_v8  ;;  %v428_v14 = vmul.f32 %v731_v10, %v395_v0  ;;  %vm433_vm4 = vweird.f32 %v731_v10 }
 0x102   : > { %734 = vrcp.f32 %v1117_v11  ;;  %v733_v16 = vpop.eup %732  ;;  %vm434_vm6 = vmor %vm432_vm5, %vm433_vm4  ;;  %v451_v48 = vand.u32 2147483647, %v1117_v11  ;;  %v453_v49 = vand.u32 2147483648, %v1117_v11  ;;  %vm447_vm13 = vweird.f32 %v1117_v11 }
 0x103   : > { %v405_v17 = vsel %vm404_vm2, %v727_v2, %v401_v13  ;;  %v429_v18 = vsub.f32 1.0, %v428_v14  ;;  %v413_v21 = vmul.f32 %v733_v16, %v394_v4  ;;  %vm418_vm8 = vweird.f32 %v733_v16 }
 0x104   : > { %v410_v20 = vsel %vm407_vm3, %v409_v15, %v405_v17  ;;  %vm419_vm10 = vmor %vm417_vm7, %vm418_vm8  ;;  %v454_v55 = vor.u32 1.1754944e-38, %v453_v49  ;;  %vm452_vm15 = vcmp.eq.f32.partialorder %v451_v48, 8.507059e+37 }
 0x105   : > { %v461_v22 = vmul.f32 %v457_v12, %v410_v20  ;;  %v430_v23 = vmul.f32 %v731_v10, %v429_v18  ;;  %v414_v26 = vsub.f32 1.0, %v413_v21 }
 0x107   : > { %v465_v27 = vadd.f32 %v461_v22, %v1089_v34  ;;  %v431_v28 = vadd.f32 %v731_v10, %v430_v23  ;;  %v415_v33 = vmul.f32 %v733_v16, %v414_v26 }
 0x108   : > { %v735_v31 = vpop.eup %734 }
 0x109   : > { %v435_v41 = vsel %vm434_vm6, %v731_v10, %v431_v28  ;;  %v443_v42 = vmul.f32 %v735_v31, %v1117_v11  ;;  %469 = vst [vmem:[%s1127_s30] sm:$0xff] %v465_v27  ;;  %v416_v43 = vadd.f32 %v733_v16, %v415_v33  ;;  %vm448_vm12 = vweird.f32 %v735_v31 }
 0x10a   : > { %v440_v34 = vsel %vm437_vm9, %v439_v29, %v435_v41  ;;  %vm449_vm14 = vmor %vm447_vm13, %vm448_vm12 }
 0x10b   : > { %v463_v44 = vmul.f32 %v459_v25, %v440_v34  ;;  %v444_v46 = vsub.f32 1.0, %v443_v42  ;;  %v420_v47 = vsel %vm419_vm10, %v733_v16, %v416_v43 }
 0x10c   : > { %v425_v51 = vsel %vm422_vm11, %v424_v45, %v420_v47 }
 0x10d   : > { %v467_v50 = vadd.f32 %v463_v44, %v1092_v35  ;;  %v445_v52 = vmul.f32 %v735_v31, %v444_v46  ;;  %v462_v36 = vmul.f32 %v458_v32, %v425_v51 }
 0x10f   : > { %v446_v54 = vadd.f32 %v735_v31, %v445_v52  ;;  %471 = vst [vmem:[%s1127_s30 + $0x10] sm:$0xff] %v467_v50  ;;  %v466_v35 = vadd.f32 %v462_v36, %v1105_v38 }
 0x111   : > { %v450_v56 = vsel %vm449_vm14, %v735_v31, %v446_v54  ;;  %470 = vst [vmem:[%s1127_s30 + $0x8] sm:$0xff] %v466_v35 }
 0x112   : > { %v455_v57 = vsel %vm452_vm15, %v454_v55, %v450_v56 }
 0x113   : > { %v464_v58 = vmul.f32 %v460_v53, %v455_v57 }
 0x115   : > { %v468_v37 = vadd.f32 %v464_v58, %v1108_v39 }
 0x117   : > { %472 = vst [vmem:[%s1127_s30 + $0x18] sm:$0xff] %v468_v37 }
 0x118   : > { %853 = shalt.err (!%p850_p11)
}
 0x119   : > { %s905_s23 = smov 128   ;;  %s906_s5 = smov 8  }
 0x11a   : > { %661 = dma.vmem_to_hbm [thread:$0]  (%p1002_p7), %s487_s19, 512, %s489_s20, %s474_s24, %s905_s23, %s905_s23, %s906_s5  }
 0x11b PF: > { %s503_s27 = sand.u32 1, %s888_s15   ;;  %p1197_p12 = scmp.ge.s32.totalorder %s900_s18, 2 }
 0x11c   : > { %s504_s21 = scalar_lea.sflag [#allocation4], %s503_s27 }
 0x11d   : > { %p675_p13 = pnand %p1197_p12, %p967_p6 }
 0x11f   : > { %p676_p0 = pneg %p675_p13 }
 0x121   : > { %883 = dma.done.wait (%p676_p0), %s504_s21, 512  }
 0x122   : > { %885 = vsyncadd (%p676_p0), %s504_s21, 4294966784  ;;  %p20_p3 = scmp.ge.s32.totalorder %s985_s29, 4   ;;  %s1198_s15 = smov %s892_s16 }
 0x123   : > { %s1199_s16 = smov %s896_s17  ;;  %s1200_s17 = smov %s998_s8 }
 0x124   : > { %s1201_s18 = smov %s985_s29  ;;  %22 = sbr.rel (!%p20_p3) target bundleno = 10 (0xa), region = 98 }
 0x129   :  { %510 = vsyncpa [#allocation3], 1 }
 0x12a   :  { %512 = vsyncpa [#allocation3 + $0x1], 1 }
 0x12b   :  { %513 = vsyncpa [#allocation6], 1 }
 0x12c   :  { %515 = vsyncpa [#allocation6 + $0x1], 1 }
 0x12d   :  { %516 = vsyncpa [#allocation4], 1 }
 0x12e   :  { %518 = vsyncpa [#allocation4 + $0x1], 1 }

</bundles_post_ra>
